<compile_context>
chip_gen: v7x
topology: tpu7x:2x2x1
jax: 0.10.0
libtpu: 0.0.40
codegen_flags: <defaults>
</compile_context>

<pallas_src>
import functools

import jax
import jax.numpy as jnp
from jax.experimental import pallas as pl
from jax.experimental.pallas import tpu as pltpu

_VMEM_LIMIT_BYTES = 48 * 1024 * 1024  # safe headroom on all of v5e/v6e/v7x


def _attention_from_pools(avg, mx, w1, w2):
    """avg, mx: (C, 1) f32 columns. w1: (Ch, C). w2: (C, Ch). Returns (C, 1) att."""
    C = avg.shape[0]
    # Stack [avg | mx] along lanes without jnp.concatenate (iota + select).
    lane = jax.lax.broadcasted_iota(jnp.int32, (C, 2), 1)
    p = jnp.where(lane == 0, avg, mx)                               # (C, 2)
    h = jnp.dot(w1, p, preferred_element_type=jnp.float32)          # (Ch, 2) one fc1
    h = jnp.maximum(h, 0.0)                                         # relu
    hsum = jnp.sum(h, axis=1, keepdims=True)                        # (Ch, 1) fc2 linear
    logits = jnp.dot(w2, hsum, preferred_element_type=jnp.float32)  # (C, 1) one fc2
    return jax.nn.sigmoid(logits)


# -------------------------- fused (whole-S) path ---------------------------

def _cam_fused_kernel(x_ref, w1_ref, w2_ref, o_ref):
    # x_ref: (1, C, S), w1_ref: (Ch, C), w2_ref: (C, Ch), o_ref: (1, C, S)
    x = x_ref[0].astype(jnp.float32)                     # (C, S), S on lanes
    s = x.shape[1]
    avg = jnp.sum(x, axis=1, keepdims=True) * (1.0 / s)  # (C, 1)
    mx = jnp.max(x, axis=1, keepdims=True)               # (C, 1)
    att = _attention_from_pools(avg, mx, w1_ref[...], w2_ref[...])
    o_ref[0] = (x * att).astype(o_ref.dtype)


# ------------------------- tiled (two-pass) path ----------------------------

def _cam_att_kernel(x_ref, w1_ref, w2_ref, att_ref, sum_sc, max_sc, *, true_s):
    # grid = (N, num_s_tiles); x_ref: (1, C, s_tile); att_ref: (1, C, 1)
    s_idx = pl.program_id(1)

    @pl.when(s_idx == 0)
    def _():
        sum_sc[...] = jnp.zeros(sum_sc.shape, jnp.float32)
        max_sc[...] = jnp.full(max_sc.shape, -jnp.inf, jnp.float32)

    x = x_ref[0].astype(jnp.float32)                     # (C, s_tile)
    C, s_tile = x.shape
    # Mask lanes past the true spatial extent (last, possibly partial, tile).
    lane = jax.lax.broadcasted_iota(jnp.int32, (C, s_tile), 1)
    valid = (s_idx * s_tile + lane) < true_s
    xs = jnp.where(valid, x, 0.0)
    xm = jnp.where(valid, x, -jnp.inf)

    sum_sc[...] += jnp.sum(xs, axis=1, keepdims=True)
    max_sc[...] = jnp.maximum(max_sc[...], jnp.max(xm, axis=1, keepdims=True))

    @pl.when(s_idx == pl.num_programs(1) - 1)
    def _():
        avg = sum_sc[...] * (1.0 / true_s)
        att_ref[0] = _attention_from_pools(avg, max_sc[...], w1_ref[...], w2_ref[...])


def _cam_apply_kernel(att_ref, x_ref, o_ref):
    # att_ref: (1, C, 1); x_ref/o_ref: (1, C, s_tile)
    o_ref[0] = (x_ref[0].astype(jnp.float32) * att_ref[0]).astype(o_ref.dtype)


# ------------------------------- wrapper ------------------------------------

def cam_forward(x_ncdhw, w1, w2, *, s_tile=None,
                vmem_budget_bytes=40 * 1024 * 1024, force_tiled=False):
    """CAM forward. x_ncdhw: (N, C, D, H, W). w1: (Ch, C), w2: (C, Ch)."""
    N, C, D, H, W = x_ncdhw.shape
    S = D * H * W
    Ch = w1.shape[0]

    # Free, contiguous reshape: channels stay on sublanes, spatial on lanes.
    x_ncs = x_ncdhw.reshape(N, C, S)

    # in + out blocks, double-buffered, f32:
    fused_bytes = 16 * C * S

    if (not force_tiled) and fused_bytes <= vmem_budget_bytes:
        out_ncs = pl.pallas_call(
            _cam_fused_kernel,
            out_shape=jax.ShapeDtypeStruct((N, C, S), x_ncs.dtype),
            grid_spec=pltpu.PrefetchScalarGridSpec(
                num_scalar_prefetch=0,
                grid=(N,),
                in_specs=[
                    pl.BlockSpec((1, C, S), lambda n: (n, 0, 0)),
                    pl.BlockSpec((Ch, C), lambda n: (0, 0)),
                    pl.BlockSpec((C, Ch), lambda n: (0, 0)),
                ],
                out_specs=pl.BlockSpec((1, C, S), lambda n: (n, 0, 0)),
            ),
            compiler_params=pltpu.CompilerParams(
                dimension_semantics=("parallel",),
                vmem_limit_bytes=_VMEM_LIMIT_BYTES),
        )(x_ncs, w1, w2)
        return out_ncs.reshape(N, C, D, H, W)

    # ---- S-tiled two-pass fallback (x read twice total, written once) ----
    if s_tile is None:
        s_tile = (vmem_budget_bytes // (16 * C)) // 128 * 128
        s_tile = max(128, min(s_tile, 8 * 1024))
    num_s = pl.cdiv(S, s_tile)

    # Pass 1: pooled stats + tiny MLP -> per-(n, c) attention (reduction axis
    # last, 'arbitrary'; output block resident across it).
    att = pl.pallas_call(
        functools.partial(_cam_att_kernel, true_s=S),
        out_shape=jax.ShapeDtypeStruct((N, C, 1), jnp.float32),
        grid_spec=pltpu.PrefetchScalarGridSpec(
            num_scalar_prefetch=0,
            grid=(N, num_s),
            in_specs=[
                pl.BlockSpec((1, C, s_tile), lambda n, s: (n, 0, s)),
                pl.BlockSpec((Ch, C), lambda n, s: (0, 0)),
                pl.BlockSpec((C, Ch), lambda n, s: (0, 0)),
            ],
            out_specs=pl.BlockSpec((1, C, 1), lambda n, s: (n, 0, 0)),
            scratch_shapes=[pltpu.VMEM((C, 1), jnp.float32),
                            pltpu.VMEM((C, 1), jnp.float32)],
        ),
        compiler_params=pltpu.CompilerParams(
            dimension_semantics=("parallel", "arbitrary"),
            vmem_limit_bytes=_VMEM_LIMIT_BYTES),
    )(x_ncs, w1, w2)

    # Pass 2: broadcast-multiply the attention back over the spatial lanes.
    out_ncs = pl.pallas_call(
        _cam_apply_kernel,
        out_shape=jax.ShapeDtypeStruct((N, C, S), x_ncs.dtype),
        grid_spec=pltpu.PrefetchScalarGridSpec(
            num_scalar_prefetch=0,
            grid=(N, num_s),
            in_specs=[
                pl.BlockSpec((1, C, 1), lambda n, s: (n, 0, 0)),
                pl.BlockSpec((1, C, s_tile), lambda n, s: (n, 0, s)),
            ],
            out_specs=pl.BlockSpec((1, C, s_tile), lambda n, s: (n, 0, s)),
        ),
        compiler_params=pltpu.CompilerParams(
            dimension_semantics=("parallel", "parallel"),
            vmem_limit_bytes=_VMEM_LIMIT_BYTES),
    )(att, x_ncs)
    return out_ncs.reshape(N, C, D, H, W)


def cam_reference(x, w1, w2):
    """Pure-JAX reference mirroring the PyTorch module (for validation)."""
    avg = jnp.mean(x, axis=(2, 3, 4))             # (N, C)
    mx = jnp.max(x, axis=(2, 3, 4))               # (N, C)

    def mlp(v):
        h = jnp.maximum(v @ w1.T, 0.0)            # fc1 + relu
        return h @ w2.T                           # fc2

    att = jax.nn.sigmoid(mlp(avg) + mlp(mx))      # (N, C)
    return x * att[:, :, None, None, None]


if __name__ == "__main__":
    # Small shapes consistent with the module: in_planes=32, ratio=16 -> hidden=2.
    N, C, D, H, W = 2, 32, 4, 8, 8
    ratio = 16
    Ch = C // ratio

    key = jax.random.PRNGKey(0)
    kx, k1, k2 = jax.random.split(key, 3)
    x = jax.random.normal(kx, (N, C, D, H, W), dtype=jnp.float32)
    # Conv3d weights (out, in, 1, 1, 1) squeezed to (out, in); no bias.
    w1 = jax.random.normal(k1, (Ch, C), dtype=jnp.float32) * (1.0 / jnp.sqrt(C))
    w2 = jax.random.normal(k2, (C, Ch), dtype=jnp.float32) * (1.0 / jnp.sqrt(Ch))

    ref = jax.block_until_ready(cam_reference(x, w1, w2))

    # Fused (whole-S in VMEM) path.
    out_fused = jax.block_until_ready(cam_forward(x, w1, w2))
    assert out_fused.shape == (N, C, D, H, W)
    assert jnp.allclose(out_fused, ref, atol=1e-5, rtol=1e-5)

    # S-tiled two-pass path (exercised explicitly; S=256 -> 2 tiles of 128).
    out_tiled = jax.block_until_ready(
        cam_forward(x, w1, w2, force_tiled=True, s_tile=128))
    assert jnp.allclose(out_tiled, ref, atol=1e-5, rtol=1e-5)

    print("KERNEL_OK")
</pallas_src>

<mosaic_0001>
module attributes {stable_mosaic.version = 11 : i64} {
  func.func @_cam_fused_kernel(%arg0: i32, %arg1: memref<1x32x256xf32, #tpu.memory_space<vmem>>, %arg2: memref<2x32xf32, #tpu.memory_space<vmem>>, %arg3: memref<32x2xf32, #tpu.memory_space<vmem>>, %arg4: memref<1x32x256xf32, #tpu.memory_space<vmem>>) attributes {dimension_semantics = [#tpu.dimension_semantics<parallel>], iteration_bounds = array<i64: 2>, scalar_prefetch = 0 : i64, scratch_operands = 0 : i64, tpu.core_type = #tpu.core_type<tc>, window_params = [{transform_indices = @transform_0, window_bounds = array<i64: 1, 32, 256>}, {pipeline_mode = #tpu.pipeline_mode<synchronous>, transform_indices = @transform_1, window_bounds = array<i64: 2, 32>}, {pipeline_mode = #tpu.pipeline_mode<synchronous>, transform_indices = @transform_2, window_bounds = array<i64: 32, 2>}, {transform_indices = @transform_3, window_bounds = array<i64: 1, 32, 256>}]} {
    %c0 = arith.constant 0 : index
    %c0_0 = arith.constant 0 : index
    %c0_1 = arith.constant 0 : index
    %0 = vector.load %arg1[%c0, %c0_0, %c0_1] : memref<1x32x256xf32, #tpu.memory_space<vmem>>, vector<1x32x256xf32>
    %1 = vector.shape_cast %0 : vector<1x32x256xf32> to vector<32x256xf32>
    %cst = arith.constant dense<0.000000e+00> : vector<32xf32>
    %2 = vector.multi_reduction <add>, %1, %cst [1] : vector<32x256xf32> to vector<32xf32>
    %3 = vector.shape_cast %2 : vector<32xf32> to vector<32x1xf32>
    %cst_2 = arith.constant 3.906250e-03 : f32
    %4 = vector.broadcast %cst_2 : f32 to vector<32x1xf32>
    %5 = arith.mulf %3, %4 : vector<32x1xf32>
    %cst_3 = arith.constant dense<0xFF800000> : vector<32xf32>
    %6 = vector.multi_reduction <maximumf>, %1, %cst_3 [1] : vector<32x256xf32> to vector<32xf32>
    %7 = vector.shape_cast %6 : vector<32xf32> to vector<32x1xf32>
    %c0_4 = arith.constant 0 : index
    %c0_5 = arith.constant 0 : index
    %8 = vector.load %arg2[%c0_4, %c0_5] : memref<2x32xf32, #tpu.memory_space<vmem>>, vector<2x32xf32>
    %c0_6 = arith.constant 0 : index
    %c0_7 = arith.constant 0 : index
    %9 = vector.load %arg3[%c0_6, %c0_7] : memref<32x2xf32, #tpu.memory_space<vmem>>, vector<32x2xf32>
    %10 = tpu.iota {dimensions = array<i32: 1>} : vector<32x2xi32>
    %c0_i32 = arith.constant 0 : i32
    %11 = vector.broadcast %c0_i32 : i32 to vector<32x2xi32>
    %12 = arith.cmpi eq, %10, %11 : vector<32x2xi32>
    %13 = vector.shape_cast %5 : vector<32x1xf32> to vector<32x1xf32>
    %14 = vector.broadcast %13 : vector<32x1xf32> to vector<32x2xf32>
    %15 = vector.shape_cast %7 : vector<32x1xf32> to vector<32x1xf32>
    %16 = vector.broadcast %15 : vector<32x1xf32> to vector<32x2xf32>
    %17 = arith.select %12, %14, %16 : vector<32x2xi1>, vector<32x2xf32>
    %cst_8 = arith.constant dense<0.000000e+00> : vector<2x2xf32>
    %18 = tpu.matmul %8, %17, %cst_8 {dimension_numbers = #tpu.dot_dimension_numbers<[1], [0], [0], [1], [0, 0, 1, 1], [], []>} : vector<2x32xf32>, vector<32x2xf32>, vector<2x2xf32> -> vector<2x2xf32>
    %cst_9 = arith.constant 0.000000e+00 : f32
    %19 = vector.broadcast %cst_9 : f32 to vector<2x2xf32>
    %20 = arith.maximumf %18, %19 : vector<2x2xf32>
    %cst_10 = arith.constant dense<0.000000e+00> : vector<2xf32>
    %21 = vector.multi_reduction <add>, %20, %cst_10 [1] : vector<2x2xf32> to vector<2xf32>
    %22 = vector.shape_cast %21 : vector<2xf32> to vector<2x1xf32>
    %cst_11 = arith.constant dense<0.000000e+00> : vector<32x1xf32>
    %23 = tpu.matmul %9, %22, %cst_11 {dimension_numbers = #tpu.dot_dimension_numbers<[1], [0], [0], [1], [0, 0, 1, 1], [], []>} : vector<32x2xf32>, vector<2x1xf32>, vector<32x1xf32> -> vector<32x1xf32>
    %24 = arith.negf %23 : vector<32x1xf32>
    %25 = math.exp %24 : vector<32x1xf32>
    %cst_12 = arith.constant 1.000000e+00 : f32
    %26 = vector.broadcast %cst_12 : f32 to vector<32x1xf32>
    %27 = arith.addf %26, %25 : vector<32x1xf32>
    %28 = arith.divf %26, %27 : vector<32x1xf32>
    %29 = vector.broadcast %28 : vector<32x1xf32> to vector<32x256xf32>
    %30 = arith.mulf %1, %29 : vector<32x256xf32>
    %c0_13 = arith.constant 0 : index
    %c0_14 = arith.constant 0 : index
    %c0_15 = arith.constant 0 : index
    %31 = vector.load %arg4[%c0_13, %c0_14, %c0_15] : memref<1x32x256xf32, #tpu.memory_space<vmem>>, vector<1x32x256xf32>
    %32 = vector.shape_cast %31 : vector<1x32x256xf32> to vector<32x256xf32>
    %33 = vector.shape_cast %30 : vector<32x256xf32> to vector<1x32x256xf32>
    tpu.vector_store %arg4[%c0_13, %c0_14, %c0_15], %33 {strides = array<i32>} : memref<1x32x256xf32, #tpu.memory_space<vmem>>, vector<1x32x256xf32>,
    return
  }
  func.func @transform_0(%arg0: i32) -> (i32, i32, i32) {
    %c0_i32 = arith.constant 0 : i32
    %c0_i32_0 = arith.constant 0 : i32
    %c0_i32_1 = arith.constant 0 : i32
    return %arg0, %c0_i32, %c0_i32_0 : i32, i32, i32
  }
  func.func @transform_1(%arg0: i32) -> (i32, i32) {
    %c0_i32 = arith.constant 0 : i32
    %c0_i32_0 = arith.constant 0 : i32
    %c0_i32_1 = arith.constant 0 : i32
    return %c0_i32, %c0_i32_0 : i32, i32
  }
  func.func @transform_2(%arg0: i32) -> (i32, i32) {
    %c0_i32 = arith.constant 0 : i32
    %c0_i32_0 = arith.constant 0 : i32
    %c0_i32_1 = arith.constant 0 : i32
    return %c0_i32, %c0_i32_0 : i32, i32
  }
  func.func @transform_3(%arg0: i32) -> (i32, i32, i32) {
    %c0_i32 = arith.constant 0 : i32
    %c0_i32_0 = arith.constant 0 : i32
    %c0_i32_1 = arith.constant 0 : i32
    return %arg0, %c0_i32, %c0_i32_0 : i32, i32, i32
  }
}

</mosaic_0001>

<bundles_post_ra>
// kernel: tpu_custom_call.1
= control target key start
LH: loop header
LB: loop body
LE: loop exit
PB: predicated region body
PF: predicated region fallthrough
CT: control target
= control target key end

     0   :  { %8 = vsyncpa [#allocation3], 0  ;;  %s1047_s0 = inlined_call_operand.hbm [shape: f32[2,32,256], index: 0, kind: input, shape index: {}]   ;;  %s1048_s1 = inlined_call_operand.vmem [shape: f32[2,32], index: 1, kind: input, shape index: {}]   ;;  %s1049_s2 = inlined_call_operand.vmem [shape: f32[32,2], index: 2, kind: input, shape index: {}]   ;;  %s1050_s3 = inlined_call_operand.hbm [shape: f32[2,32,256], index: 3, kind: output, shape index: {}]  }
   0x1   :  { %10 = vsyncpa [#allocation3 + $0x1], 0 }
   0x2   :  { %11 = vsyncpa [#allocation4], 0 }
   0x3   :  { %13 = vsyncpa [#allocation4 + $0x1], 0  ;;  %s826_s12 = smov 0   ;;  %s828_s13 = smov 0  }
   0x4   :  { %s830_s14 = smov 0   ;;  %s832_s15 = smov 0  }
   0x5 LB: > { %s847_s16 = sadd.s32 4294967295, %s794_s15   ;;  %s565_s17 = sadd.s32 4294967294, %s794_s15   ;;  %s794_s15 = sphi %s832_s15, %s1063_s15   ;;  %s790_s14 = sphi %s830_s14, %s1062_s14   ;;  %s786_s13 = sphi %s828_s13, %s1061_s13   ;;  %s782_s12 = sphi %s826_s12, %s1060_s12  }
   0x6   : > { %s851_s18 = sadd.s32 1, %s794_s15   ;;  %s26_s19 = sadd.s32 1, %s790_s14 }
   0x7   : > { %s23_s20 = ssub.s32 %s794_s15, %s851_s18  ;;  %p33_p0 = scmp.ne.s32.totalorder %s790_s14, %s786_s13 }
   0x8   : > { %p24_p1 = scmp.eq.s32.totalorder %s23_s20, 0  ;;  %p34_p2 = scmp.eq.s32.totalorder %s794_s15, 0 }
   0x9   : > { %p39_p3 = scmp.ne.s32.totalorder %s786_s13, %s782_s12  ;;  %p40_p4 = scmp.eq.s32.totalorder %s847_s16, 0 }
   0xa   : > { %s863_s21 = scalar_select %p24_p1, %s790_s14, %s26_s19  }
   0xb   : > { %p865_p5 = por %p34_p2, %p33_p0  ;;  %p869_p6 = por %p40_p4, %p39_p3 }
   0xc   : > { %p105_p7 = scmp.eq.s32.totalorder %s847_s16, 1  ;;  %p111_p8 = scmp.eq.s32.totalorder %s565_s17, 1 }
   0xd   : > { %p638_p10 = scmp.lt.s32.totalorder %s794_s15, 2  ;;  %s137_s26 = sand.u32 1, %s790_s14  }
   0xe   : > { %p876_p11 = por %p105_p7, %p33_p0  ;;  %p880_p12 = por %p111_p8, %p39_p3 }
   0xf   : > { %s589_s27 = sshll.u32 %s794_s15, 10  ;;  %s568_s28 = sshll.u32 %s137_s26, 6 }
  0x10   : > { %s1054_s24 = scalar_select %p876_p11, 1, 0 }
  0x11   : > { %s1055_s25 = scalar_select %p880_p12, 1, 0 }
  0x12   : > { %s889_s4 = scalar_lea.hbm %s1047_s0, %s589_s27  ;;  %s141_s5 = scalar_lea.vmem [#allocation2], %s568_s28 }
  0x13   : > { %s148_s6 = sshll.u32 %s141_s5, 4  ;;  %p893_p13 = pnand %p638_p10, %p865_p5  ;;  %s897_s6 = int_to_ptr.vmem [resolvable:$true] %s148_s6 }
  0x14   : > { %s899_s8 = scalar_lea.sflag [#allocation3], %s137_s26  ;;  %s698_s9 = scalar_lea.hbm %s889_s4, 1024 }
  0x15   : > { %p699_p0 = scmp.ne.s32.totalorder %s889_s4, %s698_s9  ;;  %p700_p1 = pneg %p893_p13 }
  0x16   : > { %s703_s17 = scalar_lea.hbm %s1047_s0, 2048  ;;  %p704_p4 = scmp.lt.u32.totalorder %s889_s4, %s1047_s0 }
  0x17   : > { %p701_p2 = pnand %p700_p1, %p699_p0  ;;  %p705_p5 = scmp.lt.u32.totalorder %s703_s17, %s698_s9 }
  0x18   : > { %p707_p8 = scmp.lt.u32.totalorder %s698_s9, %s889_s4 }
  0x19   : > { %p702_p3 = pneg %p701_p2  ;;  %p706_p7 = por %p705_p5, %p704_p4 }
  0x1b   : > { %p708_p10 = por %p707_p8, %p706_p7 }
  0x1d   : > { %p709_p9 = pnand %p708_p10, %p702_p3 }
  0x1f   : > { %712 = shalt.err (!%p709_p9)
}
  0x20   : > { %s713_s22 = scalar_lea.vmem %s897_s6, 1024  ;;  %s796_s26 = smov [#allocation2]  }
  0x21   : > { %p714_p0 = scmp.ne.s32.totalorder %s897_s6, %s713_s22  ;;  %s718_s27 = sshll.u32 %s796_s26, 4  ;;  %s719_s27 = int_to_ptr.vmem [resolvable:$false] %s718_s27 }
  0x22   : > { %s720_s28 = scalar_lea.vmem %s719_s27, 2048  ;;  %p721_p11 = scmp.lt.s32.totalorder %s897_s6, %s719_s27 }
  0x23   : > { %p716_p2 = pnand %p714_p0, %p700_p1  ;;  %p722_p4 = scmp.lt.s32.totalorder %s720_s28, %s713_s22 }
  0x25   : > { %p717_p12 = pneg %p716_p2  ;;  %p723_p5 = por %p722_p4, %p721_p11 }
  0x27   : > { %p724_p7 = pnand %p723_p5, %p717_p12 }
  0x29   : > { %727 = shalt.err (!%p724_p7)
}
  0x2a   : > { %s797_s29 = smov 256   ;;  %s798_s30 = smov 16  }
  0x2b   : > { %633 = dma.hbm_to_vmem [thread:$0]  (!%p893_p13), %s889_s4, 1024, %s897_s6, %s899_s8, %s797_s29, %s797_s29, %s798_s30  }
  0x2c   : > { %p571_p9 = scmp.ge.s32.totalorder %s794_s15, 1  ;;  %p156_p1 = scmp.lt.s32.totalorder %s794_s15, 3 }
  0x2e   : > { %p157_p3 = pnand %p571_p9, %p156_p1 }
  0x2f   : > { %s930_s5 = sand.u32 (!%p157_p3), 1, %s786_s13  }
  0x30   : > { %160 = sbr.rel (%p157_p3) target bundleno = 970 (0x3ca), region = 32  ;;  %s572_s9 = sshll.u32 (!%p157_p3), %s930_s5, 6 }
  0x31   : > { %s163_s10 = scalar_lea.sflag (!%p157_p3), [#allocation3], %s930_s5  ;;  %s166_s11 = scalar_lea.vmem (!%p157_p3), [#allocation2], %s572_s9 }
  0x37   : > { %773 = dma.done.wait (%p869_p6), %s163_s10, 1024  }
  0x38   : > { %775 = vsyncadd (%p869_p6), %s163_s10, 4294966272  ;;  %v940_v0 = vld [vmem:[%s166_s11] sm:$0xff]  ;;  %v942_v1 = vld [vmem:[%s166_s11 + $0x8] sm:$0xff]  ;;  %v799_v16 = vmov 0.0|0.0   ;;  %vm800_vm0 = vmmov 0   ;;  %v801_v17 = vmov 0.0   ;;  %v230_v18 = vlaneseq }
  0x39   : > { %v944_v2 = vld [vmem:[%s166_s11 + $0x10] sm:$0xff]  ;;  %v213_v3 = vmax.f32 %v940_v0, %v942_v1  ;;  %v197_v4 = vadd.f32 %v942_v1, %v940_v0  ;;  %v950_v5 = vld [vmem:[%s166_s11 + $0x18] sm:$0xff]  ;;  %v960_v10 = vld [vmem:[%s166_s11 + $0x20] sm:$0xff]  ;;  %620 = vmatprep.subr.bf16.mxu0 %v799_v16  ;;  %609 = vmatprep.mubr.msk.f32.mxu0 %vm800_vm0, %v801_v17  ;;  %vm237_vm2 = vcmask 261120   ;;  %vm312_vm3 = vcmask 9216   ;;  %s188_s27 = scalar_lea.vmem [#allocation5], %s572_s9 }
  0x3a   : > { %v216_v6 = vmax.f32 %v944_v2, %v950_v5  ;;  %v200_v7 = vadd.f32 %v950_v5, %v944_v2  ;;  %v956_v8 = vld [vmem:[%s166_s11 + $0x30] sm:$0xff]  ;;  %v958_v9 = vld [vmem:[%s166_s11 + $0x38] sm:$0xff]  ;;  %v962_v11 = vld [vmem:[%s166_s11 + $0x28] sm:$0xff]  ;;  %v231_v21 = vand.u32 127, %v230_v18  ;;  %vm316_vm4 = vcmask 15360   ;;  %s492_s28 = sshll.u32 %s188_s27, 4  ;;  %s996_s28 = int_to_ptr.vmem [resolvable:$true] %s492_s28 }
  0x3b   : > { %214 = vmax.xlane.f32.xlu1 %v213_v3  ;;  %198 = vadd.xlane.f32.xlu0 %v197_v4  ;;  %v206_v12 = vadd.f32 %v958_v9, %v956_v8  ;;  %v203_v13 = vadd.f32 %v962_v11, %v960_v10  ;;  %v222_v14 = vmax.f32 %v956_v8, %v958_v9  ;;  %v225_v38 = vld [vmem:[%s1048_s1] sm:$0x3]  ;;  %vm329_vm5 = vcmask 1041408   ;;  %v227_v45 = vld [vmem:[%s1049_s2 + $0x8] sm:$0xff]  ;;  %v228_v46 = vld [vmem:[%s1049_s2 + $0x10] sm:$0xff]  ;;  %s590_s29 = sshll.u32 %s847_s16, 10 }
  0x3c   : > { %v219_v15 = vmax.f32 %v960_v10, %v962_v11  ;;  %vm232_vm1 = vcmp.eq.s32.totalorder %v231_v21, 0  ;;  %v226_v43 = vld [vmem:[%s1049_s2] sm:$0xff]  ;;  %v229_v47 = vld [vmem:[%s1049_s2 + $0x18] sm:$0xff]  ;;  %v802_v48 = vmov 0   ;;  %s1001_s10 = scalar_lea.hbm %s1050_s3, %s590_s29  ;;  %s479_s16 = scalar_lea.sflag [#allocation4], %s930_s5 }
  0x3d   : > { %614 = vmatprep.mubr.msk.f32.mxu1 %vm316_vm4, %v226_v43  ;;  %681 = vset.pattern.permute.xlu0 %v802_v48  ;;  %s728_s11 = scalar_lea.vmem %s996_s28, 1024  ;;  %p1057_p11 = scmp.ne.s32.totalorder %s1054_s24, 0 }
  0x3e   : > { %680 = vset.pattern.permute.xlu1 %v802_v48  ;;  %p729_p6 = scmp.ne.s32.totalorder %s996_s28, %s728_s11  ;;  %s803_s23 = smov [#allocation5]  }
  0x3f   : > { %217 = vmax.xlane.f32.xlu1 %v216_v6  ;;  %201 = vadd.xlane.f32.xlu0 %v200_v7  ;;  %s732_s4 = sshll.u32 %s803_s23, 4  ;;  %s733_s4 = int_to_ptr.vmem [resolvable:$false] %s732_s4 }
  0x40   : > { %p730_p12 = pnand %p729_p6, %p1057_p11  ;;  %s734_s6 = scalar_lea.vmem %s733_s4, 2048 }
  0x41   : > { %p735_p8 = scmp.lt.s32.totalorder %s996_s28, %s733_s4  ;;  %p736_p10 = scmp.lt.s32.totalorder %s734_s6, %s728_s11 }
  0x42   : > { %p731_p13 = pneg %p730_p12 }
  0x43   : > { %207 = vadd.xlane.f32.xlu1 %v206_v12  ;;  %204 = vadd.xlane.f32.xlu0 %v203_v13  ;;  %p737_p0 = por %p736_p10, %p735_p8 }
  0x45   : > { %p738_p2 = pnand %p737_p0, %p731_p13 }
  0x47   : > { %223 = vmax.xlane.f32.xlu1 %v222_v14  ;;  %220 = vmax.xlane.f32.xlu0 %v219_v15 }
  0xc8   : > { %v215_v19 = vpop.xlane.xlu1 %214  ;;  %v199_v20 = vpop.xlane.xlu0 %198 }
  0xc9   : > { %v209_v22 = vmul.f32 0.00390625, %v199_v20 }
  0xcb   : > { %v233_v26 = vsel %vm232_vm1, %v209_v22, %v215_v19 }
  0xcc   : > { %v218_v23 = vpop.xlane.xlu1 %217  ;;  %v202_v24 = vpop.xlane.xlu0 %201 }
  0xcd   : > { %v210_v25 = vmul.f32 0.00390625, %v202_v24 }
  0xcf   : > { %v234_v27 = vsel %vm232_vm1, %v210_v25, %v218_v23 }
  0xd0   : > { %v208_v28 = vpop.xlane.xlu1 %207  ;;  %v205_v29 = vpop.xlane.xlu0 %204  ;;  %v621_v30 = vpack.c.bf16 %v234_v27, %v233_v26 }
  0xd1   : > { %v212_v31 = vmul.f32 0.00390625, %v208_v28  ;;  %v211_v32 = vmul.f32 0.00390625, %v205_v29 }
  0xd2   : > { %622 = vmatpush3.bf16.msra.mxu0 %v621_v30 }
  0xd3   : > { %623 = vmatprep.subr.bf16.mxu0 %v799_v16 }
  0xd4   : > { %v224_v33 = vpop.xlane.xlu1 %223  ;;  %v221_v34 = vpop.xlane.xlu0 %220 }
  0xd5   : > { %v236_v35 = vsel %vm232_vm1, %v212_v31, %v224_v33  ;;  %v235_v36 = vsel %vm232_vm1, %v211_v32, %v221_v34 }
  0xd6   : > { %v624_v37 = vpack.c.bf16 %v236_v35, %v235_v36 }
  0xd8   : > { %625 = vmatpush3.bf16.msra.mxu0 %v624_v37 }
  0xdb   : > { %610 = vmatmul.mubr.msk.f32.vlgmr.msra.gmra.mrb[0].mxu0 %vm237_vm2, %v225_v38 }
 0x1ae   : > { %v307_v39 = vpop.f32.mrb[0].mxu0 }
 0x1af   : > { %v311_v40 = vmax.f32 %v307_v39, 0.0  ;;  %v611_v41 = vpop.f32.mrb[1].mxu0 }
 0x1b1   : > { %v313_v42 = vsel %vm312_vm3, %v311_v40, 0.0 }
 0x1b2   : > { %314 = vadd.xlane.f32.xlu0 %v313_v42 }
 0x23f   : > { %v315_v44 = vpop.xlane.xlu0 %314 }
 0x240   : > { %612 = vmatprep.subr.msk.mxu1 %vm329_vm5, %v315_v44 }
 0x241   : > { %613 = vmatpush3.msk.msra.mxu1 %vm329_vm5, %v315_v44 }
 0x242   : > { %615 = vmatmul.mubr.msk.f32.vlgmr.msra.gmra.mrb[0].mxu1 %vm316_vm4, %v227_v45 }
 0x243   : > { %617 = vmatprep.mubr.msk.f32.mxu1 %vm316_vm4, %v228_v46 }
 0x246   : > { %618 = vmatmul.mubr.msk.f32.gmra.mrb[2].mxu1 %vm316_vm4, %v229_v47 }
 0x315   : > { %v616_v49 = vpop.f32.mrb[0].mxu1 }
 0x316   : > { %v581_v50 = vmul.f32 -1.442695, %v616_v49  ;;  %v399_v51 = vpop.f32.mrb[1].mxu1 }
 0x317   : > { %v580_v52 = vmul.f32 -1.442695, %v399_v51 }
 0x318   : > { %682 = vpow2.f32 %v581_v50 }
 0x319   : > { %684 = vpow2.f32 %v580_v52  ;;  %v619_v53 = vpop.f32.mrb[2].mxu1 }
 0x31a   : > { %v583_v54 = vmul.f32 -1.442695, %v619_v53  ;;  %v409_v55 = vpop.f32.mrb[3].mxu1 }
 0x31b   : > { %v582_v56 = vmul.f32 -1.442695, %v409_v55 }
 0x31c   : > { %686 = vpow2.f32 %v583_v54 }
 0x31d   : > { %688 = vpow2.f32 %v582_v56 }
 0x322   : > { %v683_v57 = vpop.eup %682 }
 0x323   : > { %v685_v58 = vpop.eup %684  ;;  %v431_v59 = vadd.f32 1.0, %v683_v57 }
 0x324   : > { %v430_v60 = vadd.f32 1.0, %v685_v58 }
 0x325   : > { %690 = vrcp.f32 %v431_v59 }
 0x326   : > { %v687_v61 = vpop.eup %686  ;;  %692 = vrcp.f32 %v430_v60 }
 0x327   : > { %v689_v62 = vpop.eup %688  ;;  %v433_v3 = vadd.f32 1.0, %v687_v61 }
 0x328   : > { %v432_v63 = vadd.f32 1.0, %v689_v62 }
 0x32a   : > { %694 = vrcp.f32 %v432_v63 }
 0x32b   : > { %696 = vrcp.f32 %v433_v3 }
 0x32f   : > { %v691_v4 = vpop.eup %690 }
 0x330   : > { %v693_v6 = vpop.eup %692  ;;  %449 = vperm.xlu0 %681, %v691_v4  }
 0x331   : > { %444 = vperm.xlu1 %680, %v693_v6  }
 0x334   : > { %v695_v7 = vpop.eup %694 }
 0x335   : > { %454 = vperm.xlu1 %680, %v695_v7   ;;  %v697_v12 = vpop.eup %696 }
 0x339   : > { %459 = vperm.xlu1 %680, %v697_v12  }
 0x3af   : > { %v450_v13 = vpop.permute.xlu0 %449 }
 0x3b0   : > { %v464_v14 = vmul.f32 %v450_v13, %v944_v2  ;;  %v465_v15 = vmul.f32 %v450_v13, %v950_v5  ;;  %v445_v16 = vpop.permute.xlu1 %444 }
 0x3b1   : > { %v462_v17 = vmul.f32 %v445_v16, %v940_v0  ;;  %v463_v18 = vmul.f32 %v445_v16, %v942_v1 }
 0x3b2   : > { %472 = vst [vmem:[%s188_s27 + $0x10] sm:$0xff] %v464_v14  ;;  %473 = vst [vmem:[%s188_s27 + $0x18] sm:$0xff] %v465_v15 }
 0x3b3   : > { %470 = vst [vmem:[%s188_s27] sm:$0xff] %v462_v17  ;;  %471 = vst [vmem:[%s188_s27 + $0x8] sm:$0xff] %v463_v18 }
 0x3b4   : > { %v455_v19 = vpop.permute.xlu1 %454 }
 0x3b5   : > { %v466_v20 = vmul.f32 %v455_v19, %v960_v10  ;;  %v467_v2 = vmul.f32 %v455_v19, %v962_v11 }
 0x3b7   : > { %474 = vst [vmem:[%s188_s27 + $0x20] sm:$0xff] %v466_v20  ;;  %475 = vst [vmem:[%s188_s27 + $0x28] sm:$0xff] %v467_v2 }
 0x3b8   : > { %v460_v0 = vpop.permute.xlu1 %459 }
 0x3b9   : > { %v468_v1 = vmul.f32 %v460_v0, %v956_v8  ;;  %v469_v5 = vmul.f32 %v460_v0, %v958_v9 }
 0x3bb   : > { %476 = vst [vmem:[%s188_s27 + $0x30] sm:$0xff] %v468_v1  ;;  %477 = vst [vmem:[%s188_s27 + $0x38] sm:$0xff] %v469_v5 }
 0x3bc   : > { %741 = shalt.err (!%p738_p2)
}
 0x3bd   : > { %s742_s7 = scalar_lea.hbm %s1001_s10, 1024  ;;  %s746_s19 = scalar_lea.hbm %s1050_s3, 2048 }
 0x3be   : > { %p743_p4 = scmp.ne.s32.totalorder %s1001_s10, %s742_s7  ;;  %p747_p9 = scmp.lt.u32.totalorder %s1001_s10, %s1050_s3 }
 0x3bf   : > { %p748_p1 = scmp.lt.u32.totalorder %s746_s19, %s742_s7  ;;  %p750_p6 = scmp.lt.u32.totalorder %s742_s7, %s1001_s10 }
 0x3c0   : > { %p744_p5 = pnand %p743_p4, %p1057_p11 }
 0x3c1   : > { %p749_p3 = por %p748_p1, %p747_p9 }
 0x3c2   : > { %p745_p7 = pneg %p744_p5 }
 0x3c3   : > { %p751_p12 = por %p750_p6, %p749_p3 }
 0x3c5   : > { %p752_p13 = pnand %p751_p12, %p745_p7 }
 0x3c7   : > { %755 = shalt.err (!%p752_p13)
}
 0x3c8   : > { %s804_s26 = smov 256   ;;  %s805_s27 = smov 16  }
 0x3c9   : > { %628 = dma.vmem_to_hbm [thread:$0]  (%p1057_p11), %s996_s28, 1024, %s1001_s10, %s479_s16, %s804_s26, %s804_s26, %s805_s27  }
 0x3ca PF: > { %s507_s29 = sand.u32 1, %s782_s12   ;;  %p1058_p8 = scmp.ne.s32.totalorder %s1055_s25, 0 }
 0x3cb   : > { %p1059_p10 = scmp.ge.s32.totalorder %s794_s15, 2  ;;  %s508_s30 = scalar_lea.sflag [#allocation4], %s507_s29 }
 0x3cd   : > { %p635_p0 = pnand %p1059_p10, %p1058_p8 }
 0x3cf   : > { %777 = dma.done.wait (!%p635_p0), %s508_s30, 1024  }
 0x3d0   : > { %779 = vsyncadd (!%p635_p0), %s508_s30, 4294966272  ;;  %p16_p2 = scmp.ge.s32.totalorder %s851_s18, 4   ;;  %s1060_s12 = smov %s786_s13 }
 0x3d1   : > { %s1061_s13 = smov %s790_s14  ;;  %s1062_s14 = smov %s863_s21 }
 0x3d2   : > { %s1063_s15 = smov %s851_s18  ;;  %18 = sbr.rel (!%p16_p2) target bundleno = 5 (0x5), region = 77 }
 0x3d9   :  { %513 = vsyncpa [#allocation3], 1 }
 0x3da   :  { %515 = vsyncpa [#allocation3 + $0x1], 1 }
 0x3db   :  { %516 = vsyncpa [#allocation4], 1 }
 0x3dc   :  { %518 = vsyncpa [#allocation4 + $0x1], 1 }

</bundles_post_ra>
